<compile_context>
chip_gen: v5e
topology: v5e:2x2
jax: 0.10.0
libtpu: 0.0.40
codegen_flags: <defaults>
</compile_context>

<pallas_src>
import functools

import jax
import jax.numpy as jnp
from jax.experimental import pallas as pl
from jax.experimental.pallas import tpu as pltpu

_LANES = 128
_MAX_BLOCK_ROWS = 1024          # 1024 x 128 f32 = 512 KiB per buffer per block

_TWO_PI = 6.283185307179586
_INV_2_16 = 1.0 / 65536.0


def _noise_kernel(x_ref, bits_ref, o_ref, *, std):
    """out = x + std * N(0, 1); normals from Box-Muller on 32 raw bits/elem."""
    bits = bits_ref[...]                                    # uint32, (R, 128)

    # Two 16-bit uniforms per element — fully elementwise, no cross-lane work.
    hi = (bits >> 16).astype(jnp.float32)                   # [0, 65536)
    lo = (bits & jnp.uint32(0xFFFF)).astype(jnp.float32)    # [0, 65536)
    u1 = (hi + 1.0) * jnp.float32(_INV_2_16)                # (0, 1]  -> log finite
    u2 = lo * jnp.float32(_INV_2_16)                        # [0, 1)

    # Box-Muller (cos branch).  16-bit u1 caps |z| at ~4.7 sigma — negligible
    # for std=0.05 noise injection.
    r = jnp.sqrt(-2.0 * jnp.log(u1))
    z = r * jnp.cos(jnp.float32(_TWO_PI) * u2)

    # All math in f32; single cast at the end (clean for bf16 inputs too).
    out = x_ref[...].astype(jnp.float32) + jnp.float32(std) * z
    o_ref[...] = out.astype(o_ref.dtype)


def add_noise(x, key, std=0.05):
    """x + N(0, std^2); Box-Muller + add fused in a single Pallas kernel."""
    orig_shape = x.shape
    orig_dtype = x.dtype
    n = x.size

    rows = -(-n // _LANES)
    padded_n = rows * _LANES
    flat = x.reshape(-1)
    if padded_n != n:
        # Pads at most one 128-lane row; never triggers for typical NCHW sizes.
        flat = jnp.pad(flat, (0, padded_n - n))
    x2d = flat.reshape(rows, _LANES)

    # One uniform-bits array, same footprint as x (4 B / element).
    # TODO(synk): on a pure-TPU deployment this could move on-chip via
    # pltpu.prng_seed + pltpu.prng_random_bits / pltpu.stateful_normal.
    bits = jax.random.bits(key, (rows, _LANES), dtype=jnp.uint32)

    block_rows = rows if rows <= _MAX_BLOCK_ROWS else _MAX_BLOCK_ROWS
    grid = (-(-rows // block_rows),)

    out2d = pl.pallas_call(
        functools.partial(_noise_kernel, std=std),
        out_shape=jax.ShapeDtypeStruct((rows, _LANES), orig_dtype),
        grid=grid,
        in_specs=[
            pl.BlockSpec((block_rows, _LANES), lambda i: (i, 0)),
            pl.BlockSpec((block_rows, _LANES), lambda i: (i, 0)),
        ],
        out_specs=pl.BlockSpec((block_rows, _LANES), lambda i: (i, 0)),
        compiler_params=pltpu.CompilerParams(
            dimension_semantics=("parallel",),   # independent blocks → megacore OK
        ),
    )(x2d, bits)

    out_flat = out2d.reshape(-1)
    if padded_n != n:
        out_flat = out_flat[:n]
    return out_flat.reshape(orig_shape)


if __name__ == "__main__":
    key = jax.random.PRNGKey(0)
    kx, knoise = jax.random.split(key)

    # NCHW input, matching the PyTorch module's convention.
    x = jax.random.normal(kx, (2, 4, 16, 16), dtype=jnp.float32)

    std = 0.05
    y = add_noise(x, knoise, std=std)
    y = jax.block_until_ready(y)

    assert y.shape == x.shape and y.dtype == x.dtype

    # Sanity check: added noise should be ~zero-mean with std ~= 0.05.
    noise = y - x
    m = float(jnp.mean(noise))
    s = float(jnp.std(noise))
    assert abs(m) < 0.02, f"noise mean too large: {m}"
    assert 0.5 * std < s < 1.5 * std, f"noise std off: {s}"

    print("KERNEL_OK")
</pallas_src>

<mosaic_0001>
module attributes {stable_mosaic.version = 11 : i64} {
  func.func @_noise_kernel(%arg0: i32, %arg1: memref<16x128xf32, #tpu.memory_space<vmem>>, %arg2: memref<16x128xi32, #tpu.memory_space<vmem>>, %arg3: memref<16x128xf32, #tpu.memory_space<vmem>>) attributes {dimension_semantics = [#tpu.dimension_semantics<parallel>], iteration_bounds = array<i64: 1>, scalar_prefetch = 0 : i64, scratch_operands = 0 : i64, tpu.core_type = #tpu.core_type<tc>, window_params = [{transform_indices = @transform_0, window_bounds = array<i64: 16, 128>}, {transform_indices = @transform_1, window_bounds = array<i64: 16, 128>}, {transform_indices = @transform_2, window_bounds = array<i64: 16, 128>}]} {
    %c0 = arith.constant 0 : index
    %c0_0 = arith.constant 0 : index
    %0 = vector.load %arg2[%c0, %c0_0] : memref<16x128xi32, #tpu.memory_space<vmem>>, vector<16x128xi32>
    %c16_i32 = arith.constant 16 : i32
    %1 = vector.broadcast %c16_i32 : i32 to vector<16x128xi32>
    %2 = arith.shrui %0, %1 : vector<16x128xi32>
    %3 = arith.uitofp %2 : vector<16x128xi32> to vector<16x128xf32>
    %c65535_i32 = arith.constant 65535 : i32
    %4 = vector.broadcast %c65535_i32 : i32 to vector<16x128xi32>
    %5 = arith.andi %0, %4 : vector<16x128xi32>
    %6 = arith.uitofp %5 : vector<16x128xi32> to vector<16x128xf32>
    %cst = arith.constant 1.000000e+00 : f32
    %7 = vector.broadcast %cst : f32 to vector<16x128xf32>
    %8 = arith.addf %3, %7 : vector<16x128xf32>
    %cst_1 = arith.constant 1.52587891E-5 : f32
    %9 = vector.broadcast %cst_1 : f32 to vector<16x128xf32>
    %10 = arith.mulf %8, %9 : vector<16x128xf32>
    %cst_2 = arith.constant 1.52587891E-5 : f32
    %11 = vector.broadcast %cst_2 : f32 to vector<16x128xf32>
    %12 = arith.mulf %6, %11 : vector<16x128xf32>
    %13 = math.log %10 : vector<16x128xf32>
    %cst_3 = arith.constant -2.000000e+00 : f32
    %14 = vector.broadcast %cst_3 : f32 to vector<16x128xf32>
    %15 = arith.mulf %14, %13 : vector<16x128xf32>
    %16 = math.sqrt %15 : vector<16x128xf32>
    %cst_4 = arith.constant 6.28318548 : f32
    %17 = vector.broadcast %cst_4 : f32 to vector<16x128xf32>
    %18 = arith.mulf %17, %12 : vector<16x128xf32>
    %19 = math.cos %18 : vector<16x128xf32>
    %20 = arith.mulf %16, %19 : vector<16x128xf32>
    %c0_5 = arith.constant 0 : index
    %c0_6 = arith.constant 0 : index
    %21 = vector.load %arg1[%c0_5, %c0_6] : memref<16x128xf32, #tpu.memory_space<vmem>>, vector<16x128xf32>
    %cst_7 = arith.constant 5.000000e-02 : f32
    %22 = vector.broadcast %cst_7 : f32 to vector<16x128xf32>
    %23 = arith.mulf %22, %20 : vector<16x128xf32>
    %24 = arith.addf %21, %23 : vector<16x128xf32>
    %c0_8 = arith.constant 0 : index
    %c0_9 = arith.constant 0 : index
    %25 = vector.load %arg3[%c0_8, %c0_9] : memref<16x128xf32, #tpu.memory_space<vmem>>, vector<16x128xf32>
    tpu.vector_store %arg3[%c0_8, %c0_9], %24 {strides = array<i32>} : memref<16x128xf32, #tpu.memory_space<vmem>>, vector<16x128xf32>,
    return
  }
  func.func @transform_0(%arg0: i32) -> (i32, i32) {
    %c0_i32 = arith.constant 0 : i32
    %c0_i32_0 = arith.constant 0 : i32
    return %arg0, %c0_i32 : i32, i32
  }
  func.func @transform_1(%arg0: i32) -> (i32, i32) {
    %c0_i32 = arith.constant 0 : i32
    %c0_i32_0 = arith.constant 0 : i32
    return %arg0, %c0_i32 : i32, i32
  }
  func.func @transform_2(%arg0: i32) -> (i32, i32) {
    %c0_i32 = arith.constant 0 : i32
    %c0_i32_0 = arith.constant 0 : i32
    return %arg0, %c0_i32 : i32, i32
  }
}

</mosaic_0001>

<bundles_post_ra>
// kernel: tpu_custom_call.1
= control target key start
LH: loop header
LB: loop body
LE: loop exit
PB: predicated region body
PF: predicated region fallthrough
CT: control target
= control target key end

     0   :  { %7 = vsyncpa [#allocation3], 0  ;;  %s810_s0 = inlined_call_operand.hbm [shape: f32[16,128], index: 0, kind: input, shape index: {}]   ;;  %s811_s1 = inlined_call_operand.hbm [shape: u32[16,128], index: 1, kind: input, shape index: {}]   ;;  %s812_s2 = inlined_call_operand.hbm [shape: f32[16,128], index: 2, kind: output, shape index: {}]  }
   0x1   :  { %8 = vsyncpa [#allocation6], 0 }
   0x2   :  { %9 = vsyncpa [#allocation4], 0  ;;  %s14_s11 = sshll.u32 %s810_s0, 4  ;;  %s556_s12 = smov [#allocation2]   ;;  %s15_s11 = int_to_ptr.hbm [resolvable:$true] %s14_s11 }
   0x3   :  { %s16_s13 = sshll.u32 %s556_s12, 4  ;;  %s27_s16 = sshll.u32 %s811_s1, 4  ;;  %s17_s13 = int_to_ptr.vmem [resolvable:$true] %s16_s13  ;;  %s28_s16 = int_to_ptr.hbm [resolvable:$true] %s27_s16 }
   0x4   :  { %s557_s17 = smov 128   ;;  %s558_s18 = smov 8  }
   0x5   :  { %22 = dma.hbm_to_vmem [thread:$0]  %s15_s11, 256, %s17_s13, [#allocation3], %s557_s17, %s557_s17, %s558_s18  }
   0x6   :  { %s559_s19 = smov [#allocation5]  }
   0x7   :  { %s29_s20 = sshll.u32 %s559_s19, 4  ;;  %s30_s20 = int_to_ptr.vmem [resolvable:$true] %s29_s20 }
   0x8   :  { %35 = dma.hbm_to_vmem [thread:$0]  %s28_s16, 256, %s30_s20, [#allocation6], %s557_s17, %s557_s17, %s558_s18  }
   0x9   :  { %550 = dma.done.wait [#allocation3], 256  }
   0xa   :  { %551 = vsyncadd [#allocation3], 4294967040 }
   0xb   :  { %552 = dma.done.wait [#allocation6], 256  }
   0xc   :  { %553 = vsyncadd [#allocation6], 4294967040  ;;  %v44_v0 = vld [vmem:[#allocation5] sm:$0xff]  ;;  %v595_v1 = vld [vmem:[#allocation5 + $0x8] sm:$0xff]  ;;  %v560_v38 = vmov 683565275  }
   0xd   :  { %v60_v2 = vand.u32 65535, %v44_v0  ;;  %v61_v3 = vand.u32 65535, %v595_v1  ;;  %v46_v14 = vshrl.u32 %v44_v0, 16  ;;  %v561_v40 = vmov 2475754826   ;;  %s567_s0 = smov [#allocation7]  }
   0xe   :  { %v562_v42 = vmov 2131351028   ;;  %v563_v45 = vmov 2102212464   ;;  %v564_v47 = vmov 920167782  }
   0xf   :  { %v62_v4 = vshrl.u32 %v60_v2, 16  ;;  %v68_v5 = vshrl.u32 %v61_v3, 16  ;;  %v66_v7 = vcvt.s32.f32 %v60_v2  ;;  %v72_v9 = vcvt.s32.f32 %v61_v3  ;;  %s434_s1 = sshll.u32 %s567_s0, 4  ;;  %s436_s23 = sshll.u32 %s812_s2, 4  ;;  %s435_s1 = int_to_ptr.vmem [resolvable:$true] %s434_s1  ;;  %s437_s23 = int_to_ptr.hbm [resolvable:$true] %s436_s23 }
  0x10   :  { %v48_v18 = vshrl.u32 %v46_v14, 16  ;;  %v52_v28 = vcvt.s32.f32 %v46_v14  ;;  %v565_v54 = vmov 1326507024  }
  0x11   :  { %v64_v6 = vcvt.s32.f32 %v62_v4  ;;  %v70_v8 = vcvt.s32.f32 %v68_v5 }
  0x12   :  { %v50_v22 = vcvt.s32.f32 %v48_v18  ;;  %v47_v18 = vshrl.u32 %v595_v1, 16 }
  0x13   :  { %v65_v10 = vmul.f32 65536.0, %v64_v6  ;;  %v71_v11 = vmul.f32 65536.0, %v70_v8 }
  0x14   :  { %v51_v27 = vmul.f32 65536.0, %v50_v22 }
  0x15   :  { %v67_v12 = vadd.f32 %v66_v7, %v65_v10  ;;  %v73_v13 = vadd.f32 %v72_v9, %v71_v11 }
  0x16   :  { %v53_v32 = vadd.f32 %v52_v28, %v51_v27 }
  0x17   :  { %v78_v15 = vmul.f32 1.5258789e-05, %v67_v12  ;;  %v79_v16 = vmul.f32 1.5258789e-05, %v73_v13 }
  0x18   :  { %v74_v44 = vadd.f32 1.0, %v53_v32 }
  0x19   :  { %v598_v17 = vmul.f32 6.2831855, %v78_v15  ;;  %v600_v19 = vmul.f32 6.2831855, %v79_v16 }
  0x1a   :  { %v76_v0 = vmul.f32 1.5258789e-05, %v74_v44 }
  0x1b   :  { %v115_v20 = vand.u32 2139095040, %v598_v17  ;;  %v269_v24 = vand.u32 2139095040, %v600_v19  ;;  %v112_v25 = vand.u32 2147483647, %v598_v17  ;;  %v266_v63 = vand.u32 2147483647, %v600_v19 }
  0x1c   :  { %470 = vlog2.f32 %v76_v0 }
  0x1d   :  { %v116_v21 = vshrl.u32 %v115_v20, 23  ;;  %v270_v29 = vshrl.u32 %v269_v24, 23  ;;  %v119_v30 = vand.u32 8388607, %v112_v25  ;;  %v643_v16 = vand.u32 8388607, %v266_v63 }
  0x1f   :  { %v452_v23 = vadd.s32 4294967169, %v116_v21  ;;  %v455_v34 = vadd.s32 4294967169, %v270_v29  ;;  %v120_v35 = vor.u32 8388608, %v119_v30 }
  0x21   :  { %v122_v26 = vadd.s32 1, %v452_v23  ;;  %v276_v52 = vadd.s32 1, %v455_v34  ;;  %v620_v56 = vshll.u32 %v120_v35, 8 }
  0x23   :  { %vm123_vm0 = vcmp.gt.s32.totalorder %v122_v26, 0  ;;  %vm277_vm5 = vcmp.gt.s32.totalorder %v276_v52, 0  ;;  %v161_v4 = vand.u32 65535, %v620_v56  ;;  %v162_v8 = vshrl.u32 %v620_v56, 16 }
  0x24   :  { %v124_v31 = vsel %vm123_vm0, %v122_v26, 0  ;;  %v278_v12 = vsel %vm277_vm5, %v276_v52, 0 }
  0x25   :  { %v126_v33 = vand.u32 31, %v124_v31  ;;  %v607_v36 = vshrl.u32 %v124_v31, 5  ;;  %v280_v26 = vand.u32 31, %v278_v12 }
  0x27   :  { %v127_v37 = vsub.s32 32, %v126_v33  ;;  %v129_v39 = vshll.u32 %v560_v38, %v126_v33  ;;  %v132_v41 = vshll.u32 %v561_v40, %v126_v33  ;;  %v135_v43 = vshll.u32 %v562_v42, %v126_v33 }
  0x28   :  { %v138_v46 = vshll.u32 %v563_v45, %v126_v33  ;;  %v141_v48 = vshll.u32 %v564_v47, %v126_v33  ;;  %vm144_vm1 = vcmp.lt.s32.totalorder %v607_v36, 1  ;;  %vm146_vm2 = vcmp.lt.s32.totalorder %v607_v36, 3 }
  0x29   :  { %v130_v49 = vshrl.u32 %v561_v40, %v127_v37  ;;  %v133_v50 = vshrl.u32 %v562_v42, %v127_v37  ;;  %v136_v51 = vshrl.u32 %v563_v45, %v127_v37  ;;  %v139_v53 = vshrl.u32 %v564_v47, %v127_v37 }
  0x2a   :  { %v142_v55 = vshrl.u32 %v565_v54, %v127_v37  ;;  %vm147_vm3 = vcmp.lt.s32.totalorder %v607_v36, 4  ;;  %vm145_vm4 = vcmp.lt.s32.totalorder %v607_v36, 2  ;;  %v128_v5 = vshrl.u32 %v560_v38, %v127_v37 }
  0x2b   :  { %v131_v57 = vor.u32 %v130_v49, %v129_v39  ;;  %v134_v58 = vor.u32 %v133_v50, %v132_v41  ;;  %v137_v59 = vor.u32 %v136_v51, %v135_v43  ;;  %v140_v60 = vor.u32 %v139_v53, %v138_v46 }
  0x2c   :  { %v143_v61 = vor.u32 %v142_v55, %v141_v48  ;;  %v274_v33 = vor.u32 8388608, %v643_v16  ;;  %v651_v39 = vshrl.u32 %v278_v12, 5  ;;  %v655_v46 = vsub.s32 32, %v280_v26 }
  0x2d   :  { %v152_v62 = vsel %vm144_vm1, %v131_v57, %v134_v58  ;;  %v153_v2 = vsel %vm147_vm3, %v140_v60, 920167782  ;;  %v156_v3 = vsel %vm144_vm1, %v134_v58, %v137_v59  ;;  %v149_v9 = vsel %vm147_vm3, %v137_v59, 2102212464 }
  0x2e   :  { %v154_v6 = vsel %vm146_vm2, %v137_v59, %v153_v2  ;;  %v157_v7 = vsel %vm147_vm3, %v143_v61, 1326507024  ;;  %v148_v22 = vsel %vm144_vm1, %v128_v5, %v131_v57  ;;  %v150_v23 = vsel %vm146_vm2, %v134_v58, %v149_v9  ;;  %v471_v59 = vpop.eup %470 }
  0x2f   :  { %v155_v10 = vsel %vm145_vm4, %v152_v62, %v154_v6  ;;  %v158_v11 = vsel %vm146_vm2, %v140_v60, %v157_v7  ;;  %v151_v41 = vsel %vm145_vm4, %v148_v22, %v150_v23  ;;  %v566_v51 = vmov 0  }
  0x30   :  { %v159_v13 = vsel %vm145_vm4, %v156_v3, %v158_v11  ;;  %v185_v14 = vand.u32 65535, %v155_v10  ;;  %v186_v15 = vshrl.u32 %v155_v10, 16  ;;  %v283_v3 = vshll.u32 %v560_v38, %v280_v26 }
  0x31   :  { %v163_v20 = vand.u32 65535, %v159_v13  ;;  %v164_v21 = vshrl.u32 %v159_v13, 16  ;;  %v286_v6 = vshll.u32 %v561_v40, %v280_v26  ;;  %v287_v7 = vshrl.u32 %v562_v42, %v655_v46 }
  0x32   :  { %v188_v24 = vmul.u32 %v186_v15, %v161_v4  ;;  %v189_v30 = vmul.u32 %v185_v14, %v162_v8  ;;  %v187_v31 = vmul.u32 %v185_v14, %v161_v4  ;;  %v190_v44 = vmul.u32 %v186_v15, %v162_v8 }
  0x33   :  { %v165_v27 = vmul.u32 %v163_v20, %v161_v4  ;;  %v166_v28 = vmul.u32 %v164_v21, %v161_v4  ;;  %v167_v29 = vmul.u32 %v163_v20, %v162_v8  ;;  %v168_v34 = vmul.u32 %v164_v21, %v162_v8 }
  0x34   :  { %v191_v32 = vshll.u32 %v188_v24, 16  ;;  %v193_v50 = vshll.u32 %v189_v30, 16  ;;  %v192_v53 = vshrl.u32 %v188_v24, 16  ;;  %v194_v58 = vshrl.u32 %v189_v30, 16 }
  0x35   :  { %v169_v35 = vshll.u32 %v166_v28, 16  ;;  %v171_v37 = vshll.u32 %v167_v29, 16  ;;  %v170_v43 = vshrl.u32 %v166_v28, 16  ;;  %v172_v48 = vshrl.u32 %v167_v29, 16 }
  0x36   :  { %vm195_vm7 = vc.u32 %v187_v31, %v191_v32  ;;  %v197_v55 = vadd.s32 %v191_v32, %v187_v31  ;;  %v284_v4 = vshrl.u32 %v561_v40, %v655_v46  ;;  %v289_v8 = vshll.u32 %v562_v42, %v280_v26 }
  0x37   :  { %vm173_vm6 = vc.u32 %v165_v27, %v169_v35  ;;  %v175_v49 = vadd.s32 %v169_v35, %v165_v27  ;;  %v196_v36 = vsel %vm195_vm7, 1, %v566_v51  ;;  %v290_v11 = vshrl.u32 %v563_v45, %v655_v46 }
  0x38   :  { %v174_v52 = vsel %vm173_vm6, 1, %v566_v51  ;;  %v198_v61 = vadd.s32 %v196_v36, %v190_v44  ;;  %vm199_vm9 = vc.u32 %v197_v55, %v193_v50  ;;  %v660_v62 = vadd.s32 %v197_v55, %v193_v50 }
  0x39   :  { %v176_v57 = vadd.s32 %v174_v52, %v168_v34  ;;  %vm177_vm8 = vc.u32 %v175_v49, %v171_v37  ;;  %v200_v2 = vsel %vm199_vm9, 1, %v566_v51  ;;  %v670_v10 = vor.u32 %v284_v4, %v283_v3 }
  0x3a   :  { %v178_v60 = vsel %vm177_vm8, 1, %v566_v51  ;;  %v202_v5 = vadd.s32 %v200_v2, %v198_v61  ;;  %v292_v12 = vshll.u32 %v563_v45, %v280_v26  ;;  %v675_v14 = vor.u32 %v287_v7, %v286_v6 }
  0x3b   :  { %v180_v0 = vadd.s32 %v178_v60, %v176_v57  ;;  %v293_v15 = vshrl.u32 %v564_v47, %v655_v46  ;;  %v295_v40 = vshll.u32 %v564_v47, %v280_v26  ;;  %v682_v20 = vor.u32 %v290_v11, %v289_v8 }
  0x3c   :  { %v203_v13 = vadd.s32 %v202_v5, %v192_v53  ;;  %v296_v42 = vshrl.u32 %v565_v54, %v655_v46  ;;  %vm298_vm10 = vcmp.lt.s32.totalorder %v651_v39, 1  ;;  %v54_v45 = vshrl.u32 %v47_v18, 16 }
  0x3d   :  { %v181_v9 = vadd.s32 %v180_v0, %v170_v43  ;;  %v205_v22 = vmul.u32 %v620_v56, %v151_v41  ;;  %v294_v23 = vor.u32 %v293_v15, %v292_v12  ;;  %vm300_vm12 = vcmp.lt.s32.totalorder %v651_v39, 3 }
  0x3e   :  { %v204_v21 = vadd.s32 %v203_v13, %v194_v58  ;;  %v297_v47 = vor.u32 %v296_v42, %v295_v40  ;;  %vm301_vm13 = vcmp.lt.s32.totalorder %v651_v39, 4  ;;  %vm299_vm14 = vcmp.lt.s32.totalorder %v651_v39, 2 }
  0x3f   :  { %v680_v16 = vadd.s32 %v181_v9, %v172_v48  ;;  %v306_v54 = vsel %vm298_vm10, %v670_v10, %v675_v14  ;;  %v699_v26 = vshll.u32 %v274_v33, 8  ;;  %v307_v56 = vsel %vm301_vm13, %v294_v23, 920167782 }
  0x40   :  { %v208_v24 = vadd.s32 1, %v204_v21  ;;  %v310_v27 = vsel %vm298_vm10, %v675_v14, %v682_v20  ;;  %v311_v28 = vsel %vm301_vm13, %v297_v47, 1326507024  ;;  %v56_v29 = vcvt.s32.f32 %v54_v45 }
  0x41   :  { %vm207_vm11 = vc.u32 %v680_v16, %v660_v62  ;;  %v308_v31 = vsel %vm300_vm12, %v682_v20, %v307_v56  ;;  %v312_v32 = vsel %vm300_vm12, %v294_v23, %v311_v28  ;;  %v315_v37 = vand.u32 65535, %v699_v26 }
  0x42   :  { %v209_v30 = vsel %vm207_vm11, %v208_v24, %v204_v21  ;;  %v309_v34 = vsel %vm299_vm14, %v306_v54, %v308_v31  ;;  %v313_v35 = vsel %vm299_vm14, %v310_v27, %v312_v32  ;;  %v316_v41 = vshrl.u32 %v699_v26, 16 }
  0x43   :  { %v210_v33 = vadd.s32 %v209_v30, %v205_v22  ;;  %v317_v43 = vand.u32 65535, %v313_v35  ;;  %v318_v48 = vshrl.u32 %v313_v35, 16  ;;  %v339_v49 = vand.u32 65535, %v309_v34 }
  0x44   :  { %v340_v50 = vshrl.u32 %v309_v34, 16  ;;  %v57_v52 = vmul.f32 65536.0, %v56_v29  ;;  %v58_v53 = vcvt.s32.f32 %v47_v18  ;;  %v81_v55 = vmul.f32 0.6931472, %v471_v59 }
  0x45   :  { %v211_v44 = vadd.s32 536870912, %v210_v33  ;;  %v321_v57 = vmul.u32 %v317_v43, %v316_v41  ;;  %v319_v36 = vmul.u32 %v317_v43, %v315_v37  ;;  %v320_v60 = vmul.u32 %v318_v48, %v315_v37 }
  0x46   :  { %v341_v61 = vmul.u32 %v339_v49, %v315_v37  ;;  %v342_v0 = vmul.u32 %v340_v50, %v315_v37  ;;  %v343_v2 = vmul.u32 %v339_v49, %v316_v41  ;;  %v322_v4 = vmul.u32 %v318_v48, %v316_v41 }
  0x47   :  { %v722_v58 = vshrl.u32 %v211_v44, 30  ;;  %v323_v5 = vshll.u32 %v320_v60, 16  ;;  %v325_v6 = vshll.u32 %v321_v57, 16  ;;  %v59_v7 = vadd.f32 %v58_v53, %v57_v52 }
  0x48   :  { %v725_v8 = vmul.f32 -2.0, %v81_v55  ;;  %v345_v9 = vshll.u32 %v342_v0, 16  ;;  %v344_v59 = vmul.u32 %v340_v50, %v316_v41  ;;  %v324_v11 = vshrl.u32 %v320_v60, 16 }
  0x49   :  { %v213_v3 = vshll.u32 %v722_v58, 30  ;;  %vm327_vm15 = vc.u32 %v319_v36, %v323_v5  ;;  %v329_v18 = vadd.s32 %v323_v5, %v319_v36  ;;  %v347_v13 = vshll.u32 %v343_v2, 16 }
  0x4a   :  { %v328_v12 = vsel %vm327_vm15, 1, %v566_v51  ;;  %vm349_vm0 = vc.u32 %v341_v61, %v345_v9  ;;  %v282_v42 = vshrl.u32 %v560_v38, %v655_v46  ;;  %v351_v22 = vadd.s32 %v345_v9, %v341_v61 }
  0x4b   :  { %v214_v1 = vsub.s32 %v210_v33, %v213_v3  ;;  %v330_v40 = vadd.s32 %v328_v12, %v322_v4  ;;  %vm331_vm2 = vc.u32 %v329_v18, %v325_v6  ;;  %v350_v21 = vsel %vm349_vm0, 1, %v566_v51 }
  0x4c   :  { %v332_v45 = vsel %vm331_vm2, 1, %v566_v51  ;;  %v303_v47 = vsel %vm301_vm13, %v682_v20, 2102212464  ;;  %v352_v54 = vadd.s32 %v350_v21, %v344_v59  ;;  %v326_v27 = vshrl.u32 %v321_v57, 16 }
  0x4d   :  { %vm215_vm1 = vcmp.lt.s32.totalorder %v214_v1, 0  ;;  %v216_v15 = vsub.s32 0, %v214_v1  ;;  %v334_v24 = vadd.s32 %v332_v45, %v330_v40  ;;  %v346_v28 = vshrl.u32 %v342_v0, 16 }
  0x4e   :  { %vm353_vm3 = vc.u32 %v351_v22, %v347_v13  ;;  %v302_v46 = vsel %vm298_vm10, %v282_v42, %v670_v10  ;;  %v304_v31 = vsel %vm300_vm12, %v675_v14, %v303_v47  ;;  %v75_v20 = vadd.f32 1.0, %v59_v7 }
  0x4f   :  { %v217_v23 = vsel %vm215_vm1, %v216_v15, %v214_v1  ;;  %v335_v29 = vadd.s32 %v334_v24, %v324_v11  ;;  %v354_v30 = vsel %vm353_vm3, 1, %v566_v51  ;;  %472 = vrsqrt.f32 %v725_v8 }
  0x50   :  { %v218_v56 = vclz %v217_v23  ;;  %v356_v32 = vadd.s32 %v354_v30, %v352_v54  ;;  %v206_v33 = vadd.s32 %v660_v62, %v680_v16  ;;  %v348_v34 = vshrl.u32 %v343_v2, 16 }
  0x51   :  { %v336_v35 = vadd.s32 %v335_v29, %v326_v27  ;;  %v355_v51 = vadd.s32 %v351_v22, %v347_v13  ;;  %v305_v10 = vsel %vm299_vm14, %v302_v46, %v304_v31  ;;  %v77_v14 = vmul.f32 1.5258789e-05, %v75_v20 }
  0x52   :  { %v453_v38 = vadd.s32 4294967294, %v218_v56  ;;  %v357_v37 = vadd.s32 %v356_v32, %v346_v28  ;;  %v359_v53 = vmul.u32 %v699_v26, %v305_v10  ;;  %vm114_vm6 = vcmp.lt.s32.totalorder %v598_v17, 0 }
  0x53   :  { %vm361_vm5 = vc.u32 %v336_v35, %v355_v51  ;;  %474 = vlog2.f32 %v77_v14  ;;  %vm754_vm7 = vcmp.le.f32.partialorder %v112_v25, 0.7853982  ;;  %v236_v13 = vsub.s32 4, %v722_v58 }
  0x54   :  { %vm454_vm4 = vcmp.lt.s32.totalorder %v453_v38, 0  ;;  %v358_v49 = vadd.s32 %v357_v37, %v348_v34  ;;  %v360_v46 = vadd.s32 %v355_v51, %v336_v35  ;;  %vm93_vm10 = vcmp.eq.f32.partialorder %v725_v8, inf }
  0x55   :  { %v221_v41 = vsel %vm454_vm4, 0, %v453_v38  ;;  %v473_v62 = vpop.eup %472  ;;  %v237_v47 = vsel %vm114_vm6, %v236_v13, %v722_v58  ;;  %vm95_vm12 = vcmp.eq.f32.partialorder %v725_v8, 0.0  ;;  %vm255_vm15 = vweird.f32 %v598_v17 }
  0x56   :  { %v222_v43 = vsub.s32 32, %v221_v41  ;;  %v223_v44 = vshll.u32 %v214_v1, %v221_v41  ;;  %v226_v48 = vsub.s32 4294967266, %v221_v41  ;;  %v362_v16 = vadd.s32 1, %v358_v49 }
  0x57   :  { %v87_v0 = vmul.f32 %v473_v62, %v725_v8  ;;  %v239_v28 = vsel %vm754_vm7, 0, %v237_v47  ;;  %vm268_vm0 = vcmp.lt.s32.totalorder %v600_v19, 0  ;;  %vm783_vm1 = vcmp.le.f32.partialorder %v266_v63, 0.7853982 }
  0x58   :  { %v224_v50 = vshrl.u32 %v206_v33, %v222_v43  ;;  %v227_v52 = vadd.s32 127, %v226_v48  ;;  %v363_v36 = vsel %vm361_vm5, %v362_v16, %v358_v49  ;;  %v256_v33 = vand.u32 3, %v239_v28 }
  0x59   :  { %v364_v39 = vadd.s32 %v363_v36, %v359_v53  ;;  %v88_v6 = vmul.f32 %v473_v62, %v87_v0  ;;  %v475_v26 = vpop.eup %474 }
  0x5a   :  { %v225_v55 = vor.u32 %v224_v50, %v223_v44  ;;  %v228_v57 = vshll.u32 %v227_v52, 23  ;;  %v83_v11 = vmul.f32 0.6931472, %v475_v26  ;;  %vm261_vm11 = vcmp.eq.s32.totalorder %v256_v33, 2 }
  0x5b   :  { %v365_v3 = vadd.s32 536870912, %v364_v39  ;;  %v89_v12 = vmul.f32 0.5, %v88_v6  ;;  %v96_v52 = vand.u32 2147483648, %v725_v8  ;;  %vm258_vm13 = vcmp.eq.s32.totalorder %v256_v33, 0 }
  0x5c   :  { %v229_v60 = vor.u32 4788187, %v228_v57  ;;  %v232_v61 = vcvt.s32.f32 %v225_v55  ;;  %v765_v22 = vmul.f32 -2.0, %v83_v11  ;;  %vm257_vm14 = vcmp.lt.s32.totalorder %v256_v33, 2 }
  0x5d   :  { %v749_v5 = vshrl.u32 %v365_v3, 30  ;;  %v90_v23 = vsub.f32 1.5, %v89_v12 }
  0x5e   :  { %v230_v2 = vand.u32 2147483647, %v229_v60  ;;  %476 = vrsqrt.f32 %v765_v22  ;;  %vm105_vm2 = vcmp.eq.f32.partialorder %v765_v22, inf  ;;  %vm107_vm4 = vcmp.eq.f32.partialorder %v765_v22, 0.0 }
  0x5f   :  { %v367_v1 = vshll.u32 %v749_v5, 30  ;;  %v91_v38 = vmul.f32 %v473_v62, %v90_v23  ;;  %v390_v11 = vsub.s32 4, %v749_v5 }
  0x60   :  { %v233_v4 = vmul.f32 %v232_v61, %v230_v2 }
  0x61   :  { %v368_v59 = vsub.s32 %v364_v39, %v367_v1  ;;  %v92_v43 = vmul.f32 %v91_v38, %v725_v8  ;;  %v422_v1 = vld [vmem:[#allocation2] sm:$0xff] }
  0x62   :  { %v234_v9 = vxor.u32 2147483648, %v233_v4 }
  0x63   :  { %vm369_vm8 = vcmp.lt.s32.totalorder %v368_v59, 0  ;;  %v370_v25 = vsub.s32 0, %v368_v59  ;;  %v94_v16 = vsel %vm93_vm10, %v725_v8, %v92_v43 }
  0x64   :  { %v235_v18 = vsel %vm114_vm6, %v234_v9, %v233_v4  ;;  %v477_v50 = vpop.eup %476  ;;  %v97_v0 = vsel %vm95_vm12, %v96_v52, %v94_v16 }
  0x65   :  { %v238_v15 = vsel %vm754_vm7, %v598_v17, %v235_v18  ;;  %v371_v21 = vsel %vm369_vm8, %v370_v25, %v368_v59  ;;  %v99_v36 = vmul.f32 %v477_v50, %v765_v22  ;;  %vm409_vm7 = vweird.f32 %v600_v19 }
  0x66   :  { %v240_v40 = vmul.f32 %v238_v15, %v238_v15  ;;  %v372_v24 = vclz %v371_v21 }
  0x67   :  { %v100_v6 = vmul.f32 %v477_v50, %v99_v36 }
  0x68   :  { %v241_v42 = vmul.f32 -0.001358992, %v240_v40  ;;  %v248_v45 = vmul.f32 -0.00019511016, %v240_v40  ;;  %v456_v27 = vadd.s32 4294967294, %v372_v24 }
  0x6a   :  { %v242_v54 = vadd.f32 0.041655596, %v241_v42  ;;  %v249_v56 = vadd.f32 0.008332121, %v248_v45  ;;  %vm457_vm9 = vcmp.lt.s32.totalorder %v456_v27, 0  ;;  %v391_v42 = vsel %vm268_vm0, %v390_v11, %v749_v5 }
  0x6b   :  { %v375_v20 = vsel %vm457_vm9, 0, %v456_v27  ;;  %v393_v23 = vsel %vm783_vm1, 0, %v391_v42  ;;  %v108_v5 = vand.u32 2147483648, %v765_v22 }
  0x6c   :  { %v243_v29 = vmul.f32 %v242_v54, %v240_v40  ;;  %v250_v30 = vmul.f32 %v249_v56, %v240_v40  ;;  %v376_v34 = vsub.s32 32, %v375_v20  ;;  %v377_v58 = vshll.u32 %v368_v59, %v375_v20 }
  0x6d   :  { %v380_v37 = vsub.s32 4294967266, %v375_v20  ;;  %v101_v59 = vmul.f32 0.5, %v100_v6  ;;  %v410_v28 = vand.u32 3, %v393_v23 }
  0x6e   :  { %v244_v31 = vadd.f32 -0.4999988, %v243_v29  ;;  %v251_v32 = vadd.f32 -0.16666654, %v250_v30  ;;  %v378_v44 = vshrl.u32 %v360_v46, %v376_v34 }
  0x6f   :  { %v381_v48 = vadd.s32 127, %v380_v37  ;;  %v102_v25 = vsub.f32 1.5, %v101_v59  ;;  %vm415_vm3 = vcmp.eq.s32.totalorder %v410_v28, 2  ;;  %vm412_vm5 = vcmp.eq.s32.totalorder %v410_v28, 0 }
  0x70   :  { %v245_v41 = vmul.f32 %v244_v31, %v240_v40  ;;  %v252_v10 = vmul.f32 %v251_v32, %v240_v40  ;;  %v379_v35 = vor.u32 %v378_v44, %v377_v58  ;;  %vm411_vm6 = vcmp.lt.s32.totalorder %v410_v28, 2 }
  0x71   :  { %v382_v51 = vshll.u32 %v381_v48, 23  ;;  %v103_v54 = vmul.f32 %v477_v50, %v102_v25  ;;  %v423_v48 = vld [vmem:[#allocation2 + $0x8] sm:$0xff] }
  0x72   :  { %v246_v14 = vadd.f32 1.0, %v245_v41  ;;  %v253_v49 = vadd.f32 1.0, %v252_v10  ;;  %v386_v57 = vcvt.s32.f32 %v379_v35 }
  0x73   :  { %v383_v55 = vor.u32 4788187, %v382_v51  ;;  %v104_v38 = vmul.f32 %v103_v54, %v765_v22 }
  0x74   :  { %v254_v53 = vmul.f32 %v253_v49, %v238_v15  ;;  %v262_v62 = vxor.u32 2147483648, %v246_v14 }
  0x75   :  { %v384_v39 = vand.u32 2147483647, %v383_v55  ;;  %v106_v33 = vsel %vm105_vm2, %v765_v22, %v104_v38 }
  0x76   :  { %v259_v60 = vxor.u32 2147483648, %v254_v53  ;;  %v263_v61 = vsel %vm261_vm11, %v262_v62, %v254_v53  ;;  %v109_v37 = vsel %vm107_vm4, %v108_v5, %v106_v33 }
  0x77   :  { %v387_v4 = vmul.f32 %v386_v57, %v384_v39 }
  0x78   :  { %v260_v2 = vsel %vm258_vm13, %v246_v14, %v259_v60 }
  0x79   :  { %v264_v3 = vsel %vm257_vm14, %v260_v2, %v263_v61  ;;  %v388_v7 = vxor.u32 2147483648, %v387_v4 }
  0x7a   :  { %v265_v26 = vsel %vm255_vm15, nan, %v264_v3 }
  0x7b   :  { %v420_v9 = vmul.f32 %v265_v26, %v97_v0  ;;  %v389_v17 = vsel %vm268_vm0, %v388_v7, %v387_v4 }
  0x7c   :  { %v392_v12 = vsel %vm783_vm1, %v600_v19, %v389_v17 }
  0x7d   :  { %v424_v18 = vmul.f32 0.05, %v420_v9  ;;  %v394_v13 = vmul.f32 %v392_v12, %v392_v12 }
  0x7f   :  { %v426_v15 = vadd.f32 %v424_v18, %v422_v1  ;;  %v395_v63 = vmul.f32 -0.001358992, %v394_v13  ;;  %v402_v40 = vmul.f32 -0.00019511016, %v394_v13 }
  0x81   :  { %428 = vst [vmem:[#allocation7] sm:$0xff] %v426_v15  ;;  %v396_v45 = vadd.f32 0.041655596, %v395_v63  ;;  %v403_v21 = vadd.f32 0.008332121, %v402_v40 }
  0x83   :  { %v397_v47 = vmul.f32 %v396_v45, %v394_v13  ;;  %v404_v24 = vmul.f32 %v403_v21, %v394_v13 }
  0x85   :  { %v398_v56 = vadd.f32 -0.4999988, %v397_v47  ;;  %v405_v27 = vadd.f32 -0.16666654, %v404_v24 }
  0x87   :  { %v399_v29 = vmul.f32 %v398_v56, %v394_v13  ;;  %v406_v30 = vmul.f32 %v405_v27, %v394_v13 }
  0x89   :  { %v400_v46 = vadd.f32 1.0, %v399_v29  ;;  %v407_v31 = vadd.f32 1.0, %v406_v30 }
  0x8b   :  { %v408_v32 = vmul.f32 %v407_v31, %v392_v12  ;;  %v416_v20 = vxor.u32 2147483648, %v400_v46 }
  0x8d   :  { %v413_v34 = vxor.u32 2147483648, %v408_v32  ;;  %v417_v58 = vsel %vm415_vm3, %v416_v20, %v408_v32 }
  0x8f   :  { %v414_v41 = vsel %vm412_vm5, %v400_v46, %v413_v34 }
  0x90   :  { %v418_v10 = vsel %vm411_vm6, %v414_v41, %v417_v58 }
  0x91   :  { %v419_v43 = vsel %vm409_vm7, nan, %v418_v10 }
  0x92   :  { %v421_v44 = vmul.f32 %v419_v43, %v109_v37 }
  0x94   :  { %v425_v14 = vmul.f32 0.05, %v421_v44 }
  0x96   :  { %v427_v22 = vadd.f32 %v425_v14, %v423_v48 }
  0x98   :  { %429 = vst [vmem:[#allocation7 + $0x8] sm:$0xff] %v427_v22 }
  0x99   :  { %442 = dma.vmem_to_hbm [thread:$0]  %s435_s1, 256, %s437_s23, [#allocation4], %s557_s17, %s557_s17, %s558_s18  }
  0x9a   :  { %554 = dma.done.wait [#allocation4], 256  }
  0x9b   :  { %555 = vsyncadd [#allocation4], 4294967040 }
  0x9c   :  { %447 = vsyncpa [#allocation3], 1 }
  0x9d   :  { %448 = vsyncpa [#allocation6], 1 }
  0x9e   :  { %449 = vsyncpa [#allocation4], 1 }

</bundles_post_ra>
